<compile_context>
chip_gen: v5e
topology: v5e:2x2
jax: 0.10.0
libtpu: 0.0.40
codegen_flags: <defaults>
</compile_context>

<pallas_src>
import functools
import math

import jax
import jax.numpy as jnp
from jax.experimental import pallas as pl
from jax.experimental.pallas import tpu as pltpu


# Use the single-matmul path when kron(Wh, Ww) is at most this many bytes.
# (On v5e the redundant-FLOP crossover is lower; 4 MiB is still memory-bound
#  on v6e/v7x and close to neutral on v5e for typical decoder shapes.)
_KRON_BYTES_LIMIT = 4 * 1024 * 1024


def _round_up(v: int, m: int) -> int:
    return ((v + m - 1) // m) * m


def _sublane(itemsize: int) -> int:
    return {4: 8, 2: 16, 1: 32}.get(itemsize, 8)


def _tile_bytes(rows: int, cols: int, dtype) -> int:
    """Bytes of one (rows, cols) VMEM tile after (sublane, 128-lane) padding."""
    it = jnp.dtype(dtype).itemsize
    return _round_up(max(rows, 1), _sublane(it)) * _round_up(max(cols, 1), 128) * it


@functools.lru_cache(maxsize=1)
def _vmem_config():
    """(pipeline-buffer budget bytes, scoped vmem limit bytes) per generation."""
    cap = None
    try:
        cap = getattr(pltpu.get_tpu_info(), "vmem_capacity_bytes", None)
    except Exception:
        cap = None
    if cap is None:
        return 16 << 20, 40 << 20          # unknown generation: safe everywhere
    if cap >= 96 << 20:                    # v5e / v6e: 128 MiB physical VMEM
        return 40 << 20, 80 << 20
    return 22 << 20, 48 << 20              # v7x-class: 64 MiB per TensorCore


def _interp_matrix(out_size: int, in_size: int, scale) -> jnp.ndarray:
    """1-D bilinear interpolation matrix, PyTorch align_corners=False /
    scale_factor semantics (src = (dst+0.5)/scale - 0.5, clamped)."""
    dst = jnp.arange(out_size, dtype=jnp.float32)
    src = (dst + 0.5) / float(scale) - 0.5
    src = jnp.clip(src, 0.0, float(in_size - 1))
    lo = jnp.floor(src).astype(jnp.int32)
    hi = jnp.minimum(lo + 1, in_size - 1)
    frac = src - lo.astype(jnp.float32)
    rows = jnp.arange(out_size)
    w = jnp.zeros((out_size, in_size), jnp.float32)
    w = w.at[rows, lo].add(1.0 - frac)
    w = w.at[rows, hi].add(frac)
    return w


# ----------------------------------------------------------------------------
# Kernels
# ----------------------------------------------------------------------------
def _kron_kernel(x_ref, kt_ref, o_ref):
    # x_ref: (bm, H*W)   kt_ref: (H*W, bn)   o_ref: (bm, bn)
    o_ref[...] = jnp.dot(
        x_ref[...], kt_ref[...], preferred_element_type=jnp.float32
    ).astype(o_ref.dtype)


def _two_pass_kernel(x_ref, wh_ref, wwt_ref, o_ref, t_ref):
    # x_ref: (bc, H, W)  wh_ref: (Ho, H)  wwt_ref: (W, Wo)
    # o_ref: (bc, Ho*Wo)  t_ref: (H, bc*Wo) f32 VMEM scratch
    bc, h, w = x_ref.shape
    ho = wh_ref.shape[0]
    wo = wwt_ref.shape[1]
    # Width pass: one lane-dense (bc*H, W) @ (W, Wo) MXU matmul over the whole
    # channel block (no per-slice loop).
    t = jnp.dot(x_ref[...].reshape(bc * h, w), wwt_ref[...],
                preferred_element_type=jnp.float32)                 # (bc*H, Wo)
    # Re-layout so H becomes the contraction dim of a single big matmul.
    # Staged through explicit VMEM scratch (keeps it off the vreg spill path).
    t_ref[...] = jnp.transpose(t.reshape(bc, h, wo), (1, 0, 2)).reshape(h, bc * wo)
    # Height pass: one lane-dense (Ho, H) @ (H, bc*Wo) MXU matmul.
    y = jnp.dot(wh_ref[...], t_ref[...],
                preferred_element_type=jnp.float32)                 # (Ho, bc*Wo)
    # Single whole-block lane-dense store of the (bc, Ho*Wo) slab.
    o_ref[...] = (jnp.transpose(y.reshape(ho, bc, wo), (1, 0, 2))
                  .reshape(bc, ho * wo)
                  .astype(o_ref.dtype))


# ----------------------------------------------------------------------------
# Wrapper
# ----------------------------------------------------------------------------
@functools.partial(jax.jit, static_argnames=("scale",))
def bilinear_upsample(x: jnp.ndarray, scale) -> jnp.ndarray:
    """x: (N, C, H, W) -> (N, C, floor(H*scale), floor(W*scale)), bilinear,
    half-pixel (PyTorch align_corners=False, scale_factor semantics)."""
    n, c, h, w = x.shape
    ho = int(math.floor(h * scale))
    wo = int(math.floor(w * scale))
    nc = n * c
    out_dtype = x.dtype
    it_x = jnp.dtype(x.dtype).itemsize
    # bf16 inputs -> bf16 weights (full-rate MXU, half the weight DMA/VMEM).
    wt_dtype = jnp.bfloat16 if x.dtype == jnp.bfloat16 else jnp.float32
    it_w = jnp.dtype(wt_dtype).itemsize

    budget, vmem_limit = _vmem_config()

    wh_f = _interp_matrix(ho, h, scale)          # (Ho, H) f32
    ww_f = _interp_matrix(wo, w, scale)          # (Wo, W) f32

    kron_raw_bytes = (h * w) * (ho * wo) * it_w
    if kron_raw_bytes <= _KRON_BYTES_LIMIT:
        # ---------------- single lane-dense matmul ("kron") path ------------
        kt = jnp.kron(wh_f, ww_f).T.astype(wt_dtype)     # (H*W, Ho*Wo)
        x_flat = x.reshape(nc, h * w)

        # Padded, double-buffered VMEM accounting.
        kt_bytes = 2 * _tile_bytes(h * w, ho * wo, wt_dtype)
        row_bytes = (2 * (_round_up(h * w, 128) * it_x
                          + _round_up(ho * wo, 128) * it_x)
                     + _round_up(ho * wo, 128) * 4)       # f32 matmul accum
        avail = max(budget - kt_bytes, 8 * row_bytes)
        bm = max(8, (avail // row_bytes) // 8 * 8)
        if bm >= nc:
            bm = nc
        n_rows = pl.cdiv(nc, bm)

        # Guarantee >=2 grid steps: split output columns (overlaps the kt DMA
        # with compute and feeds both v7x TensorCores), else split rows.
        ncol = 1
        bn = ho * wo
        if n_rows < 2 and (ho * wo) % 256 == 0:
            ncol = 2
            bn = (ho * wo) // 2
        elif n_rows < 2 and nc >= 16:
            bm = max(8, ((nc // 2) // 8) * 8)
            n_rows = pl.cdiv(nc, bm)

        out_flat = pl.pallas_call(
            _kron_kernel,
            out_shape=jax.ShapeDtypeStruct((nc, ho * wo), out_dtype),
            grid=(int(n_rows), int(ncol)),
            in_specs=[
                pl.BlockSpec((bm, h * w), lambda i, j: (i, 0)),
                pl.BlockSpec((h * w, bn), lambda i, j: (0, j)),
            ],
            out_specs=pl.BlockSpec((bm, bn), lambda i, j: (i, j)),
            compiler_params=pltpu.CompilerParams(
                dimension_semantics=("parallel", "parallel"),
                vmem_limit_bytes=vmem_limit,
            ),
        )(x_flat, kt)
        return out_flat.reshape(n, c, ho, wo)

    # ---------------- general path: channel-blocked two-pass matmuls --------
    wh = wh_f.astype(wt_dtype)                   # (Ho, H)
    wwt = ww_f.T.astype(wt_dtype)                # (W, Wo), pre-transposed on host
    xb = x.reshape(nc, h, w)

    # Padded per-channel footprint (double-buffered in/out + scratch + the big
    # in-kernel f32 temporaries) and fixed weight-buffer bytes.
    in_slice = _round_up(h, _sublane(it_x)) * _round_up(w, 128) * it_x
    out_slice = _round_up(ho * wo, 128) * it_x
    scr_slice = _round_up(h, 8) * wo * 4
    tmp_slice = (_round_up(h, 8) + 2 * _round_up(ho, 8)) * _round_up(wo, 128) * 4
    per_ch = 2 * in_slice + 2 * out_slice + scr_slice + tmp_slice
    fixed = 2 * (_tile_bytes(ho, h, wt_dtype) + _tile_bytes(w, wo, wt_dtype))

    bc = max(1, (budget - fixed) // per_ch)
    if bc >= nc:
        bc = nc
    else:
        bc = min(nc, max(8, (bc // 8) * 8))       # output-block sublane rule
    # Keep >=2 grid steps when there is enough work for both v7x TensorCores.
    if bc == nc and nc >= 16:
        bc = max(8, ((nc // 2) // 8) * 8)
    n_blocks = pl.cdiv(nc, bc)

    out_flat = pl.pallas_call(
        _two_pass_kernel,
        out_shape=jax.ShapeDtypeStruct((nc, ho * wo), out_dtype),
        grid=(int(n_blocks),),
        in_specs=[
            pl.BlockSpec((bc, h, w), lambda i: (i, 0, 0)),
            pl.BlockSpec((ho, h), lambda i: (0, 0)),
            pl.BlockSpec((w, wo), lambda i: (0, 0)),
        ],
        out_specs=pl.BlockSpec((bc, ho * wo), lambda i: (i, 0)),
        scratch_shapes=[pltpu.VMEM((h, bc * wo), jnp.float32)],
        compiler_params=pltpu.CompilerParams(
            dimension_semantics=("parallel",),
            vmem_limit_bytes=vmem_limit,
        ),
    )(xb, wh, wwt)
    return out_flat.reshape(n, c, ho, wo)


class Interpolate:
    """JAX/Pallas equivalent of the PyTorch Interpolate module."""

    def __init__(self, scale=(2, 4), mode="bilinear"):
        assert mode == "bilinear", "only bilinear is implemented"
        # TODO(synk): 'nearest'/'bicubic' modes of F.interpolate are not implemented.
        self.scale_list = scale
        self.mode = mode

    def __call__(self, x_list):
        for i in range(len(self.scale_list)):
            x_list[i] = bilinear_upsample(x_list[i], self.scale_list[i])
        return x_list


if __name__ == "__main__":
    key = jax.random.PRNGKey(0)
    k0, k1, k2 = jax.random.split(key, 3)

    # Small deterministic inputs (NCHW), one per entry of scale_list.
    x0 = jax.random.normal(k0, (2, 4, 16, 16), dtype=jnp.float32)
    x1 = jax.random.normal(k1, (2, 4, 8, 8), dtype=jnp.float32)

    module = Interpolate(scale=(2, 4), mode="bilinear")
    outs = module([x0, x1])
    outs = [jax.block_until_ready(o) for o in outs]

    assert outs[0].shape == (2, 4, 32, 32), outs[0].shape
    assert outs[1].shape == (2, 4, 32, 32), outs[1].shape

    # Reference: jax.image.resize bilinear uses the same half-pixel convention
    # as PyTorch's align_corners=False (identical for integer upscales).
    ref0 = jax.image.resize(x0, (2, 4, 32, 32), method="bilinear")
    ref1 = jax.image.resize(x1, (2, 4, 32, 32), method="bilinear")
    assert jnp.max(jnp.abs(outs[0] - ref0)) < 1e-3
    assert jnp.max(jnp.abs(outs[1] - ref1)) < 1e-3

    # Also exercise the general (channel-blocked two-pass) path.
    x2 = jax.random.normal(k2, (1, 2, 40, 40), dtype=jnp.float32)
    out2 = jax.block_until_ready(bilinear_upsample(x2, 2))
    ref2 = jax.image.resize(x2, (1, 2, 80, 80), method="bilinear")
    assert out2.shape == (1, 2, 80, 80), out2.shape
    assert jnp.max(jnp.abs(out2 - ref2)) < 1e-3

    print("KERNEL_OK")
</pallas_src>

<mosaic_0001>
module attributes {stable_mosaic.version = 11 : i64} {
  func.func @_kron_kernel(%arg0: i32, %arg1: i32, %arg2: memref<8x256xf32, #tpu.memory_space<vmem>>, %arg3: memref<256x512xf32, #tpu.memory_space<vmem>>, %arg4: memref<8x512xf32, #tpu.memory_space<vmem>>) attributes {dimension_semantics = [#tpu.dimension_semantics<parallel>, #tpu.dimension_semantics<parallel>], iteration_bounds = array<i64: 1, 2>, scalar_prefetch = 0 : i64, scratch_operands = 0 : i64, tpu.core_type = #tpu.core_type<tc>, window_params = [{transform_indices = @transform_0, window_bounds = array<i64: 8, 256>}, {transform_indices = @transform_1, window_bounds = array<i64: 256, 512>}, {transform_indices = @transform_2, window_bounds = array<i64: 8, 512>}]} {
    %c0 = arith.constant 0 : index
    %c0_0 = arith.constant 0 : index
    %0 = vector.load %arg2[%c0, %c0_0] : memref<8x256xf32, #tpu.memory_space<vmem>>, vector<8x256xf32>
    %c0_1 = arith.constant 0 : index
    %c0_2 = arith.constant 0 : index
    %1 = vector.load %arg3[%c0_1, %c0_2] : memref<256x512xf32, #tpu.memory_space<vmem>>, vector<256x512xf32>
    %cst = arith.constant dense<0.000000e+00> : vector<8x512xf32>
    %2 = tpu.matmul %0, %1, %cst {dimension_numbers = #tpu.dot_dimension_numbers<[1], [0], [0], [1], [0, 0, 1, 1], [], []>} : vector<8x256xf32>, vector<256x512xf32>, vector<8x512xf32> -> vector<8x512xf32>
    %c0_3 = arith.constant 0 : index
    %c0_4 = arith.constant 0 : index
    %3 = vector.load %arg4[%c0_3, %c0_4] : memref<8x512xf32, #tpu.memory_space<vmem>>, vector<8x512xf32>
    tpu.vector_store %arg4[%c0_3, %c0_4], %2 {strides = array<i32>} : memref<8x512xf32, #tpu.memory_space<vmem>>, vector<8x512xf32>,
    return
  }
  func.func @transform_0(%arg0: i32, %arg1: i32) -> (i32, i32) {
    %c0_i32 = arith.constant 0 : i32
    %c0_i32_0 = arith.constant 0 : i32
    return %arg0, %c0_i32 : i32, i32
  }
  func.func @transform_1(%arg0: i32, %arg1: i32) -> (i32, i32) {
    %c0_i32 = arith.constant 0 : i32
    %c0_i32_0 = arith.constant 0 : i32
    return %c0_i32, %arg1 : i32, i32
  }
  func.func @transform_2(%arg0: i32, %arg1: i32) -> (i32, i32) {
    %c0_i32 = arith.constant 0 : i32
    return %arg0, %arg1 : i32, i32
  }
}

</mosaic_0001>

<bundles_post_ra>
// kernel: bilinear_upsample.1
= control target key start
LH: loop header
LB: loop body
LE: loop exit
PB: predicated region body
PF: predicated region fallthrough
CT: control target
= control target key end

     0   :  { %s968_s9 = smov 0   ;;  %s970_s10 = smov 0   ;;  %s1429_s0 = inlined_call_operand.vmem [shape: f32[8,256], index: 0, kind: input, shape index: {}]   ;;  %s1430_s1 = inlined_call_operand.vmem [shape: f32[256,1024], index: 1, kind: input, shape index: {}]   ;;  %s1431_s2 = inlined_call_operand.vmem [shape: f32[8,1024], index: 2, kind: output, shape index: {}]  }
   0x1   :  { %s972_s11 = smov 0   ;;  %s974_s12 = smov 0  }
   0x2   :  { %s976_s13 = smov 0  }
   0x3 LB: > { %s21_s14 = sadd.s32 1, %s947_s12  ;;  %p64_p1 = scmp.ne.s32.totalorder %s939_s10, %s935_s9  ;;  %s951_s13 = sphi %s976_s13, %s12_s13   ;;  %s947_s12 = sphi %s974_s12, %s1435_s12   ;;  %s943_s11 = sphi %s972_s11, %s1434_s11   ;;  %s939_s10 = sphi %s970_s10, %s1433_s10   ;;  %s935_s9 = sphi %s968_s9, %s1432_s9  }
   0x4   : > { %p22_p0 = scmp.ge.s32.totalorder %s21_s14, 2  ;;  %p65_p2 = scmp.eq.s32.totalorder %s951_s13, 0 }
   0x5   : > { %s57_s16 = sadd.s32 1, %s939_s10  ;;  %p862_p5 = scmp.ge.s32.totalorder %s951_s13, 2 }
   0x6   : > { %s1437_s14 = smov (%p22_p0, %s21_s14), 0  ;;  %p66_p3 = por %p65_p2, %p64_p1 }
   0x7   : > { %s54_s15 = ssub.s32 %s947_s12, %s1437_s14  ;;  %126 = sbr.rel (%p862_p5) target bundleno = 144 (0x90), region = 20 }
   0x8   : > { %p55_p4 = scmp.eq.s32.totalorder %s54_s15, 0 }
   0xa   : > { %s1003_s17 = scalar_select %p55_p4, %s939_s10, %s57_s16  }
   0xc   : > { %129 = sbr.rel (!%p66_p3) target bundleno = 144 (0x90), region = 24  ;;  %s131_s18 = sand.u32 (%p66_p3), 1, %s939_s10  }
   0xd   : > { %s872_s19 = sshll.u32 (%p66_p3), %s947_s12, 5  ;;  %s863_s20 = sshll.u32 (%p66_p3), %s131_s18, 10 }
   0xe   : > { %s1011_s23 = scalar_lea.vmem (%p66_p3), %s1430_s1, %s872_s19  ;;  %s1016_s24 = scalar_lea.vmem (%p66_p3), [#allocation2], %s863_s20 }
   0xf   : > { %v149_v0 = vld [vmem:[%s1011_s23] sm:$0xff] (%p66_p3)  ;;  %v151_v1 = vld [vmem:[%s1011_s23 + $0x8] sm:$0xff] (%p66_p3)  ;;  %v153_v2 = vld [vmem:[%s1011_s23 + $0x10] sm:$0xff] (%p66_p3) }
  0x10   : > { %150 = vst [vmem:[%s1016_s24] sm:$0xff] (%p66_p3), %v149_v0  ;;  %v155_v3 = vld [vmem:[%s1011_s23 + $0x18] sm:$0xff] (%p66_p3)  ;;  %v157_v4 = vld [vmem:[%s1011_s23 + $0x40] sm:$0xff] (%p66_p3)  ;;  %v159_v5 = vld [vmem:[%s1011_s23 + $0x48] sm:$0xff] (%p66_p3) }
  0x11   : > { %152 = vst [vmem:[%s1016_s24 + $0x8] sm:$0xff] %v151_v1  ;;  %v161_v6 = vld [vmem:[%s1011_s23 + $0x50] sm:$0xff]  ;;  %v163_v7 = vld [vmem:[%s1011_s23 + $0x58] sm:$0xff]  ;;  %v165_v8 = vld [vmem:[%s1011_s23 + $0x80] sm:$0xff] }
  0x12   : > { %154 = vst [vmem:[%s1016_s24 + $0x10] sm:$0xff] %v153_v2  ;;  %v167_v9 = vld [vmem:[%s1011_s23 + $0x88] sm:$0xff]  ;;  %v169_v10 = vld [vmem:[%s1011_s23 + $0x90] sm:$0xff]  ;;  %v171_v11 = vld [vmem:[%s1011_s23 + $0x98] sm:$0xff] }
  0x13   : > { %156 = vst [vmem:[%s1016_s24 + $0x18] sm:$0xff] %v155_v3  ;;  %v173_v12 = vld [vmem:[%s1011_s23 + $0xc0] sm:$0xff]  ;;  %v175_v13 = vld [vmem:[%s1011_s23 + $0xc8] sm:$0xff]  ;;  %v177_v14 = vld [vmem:[%s1011_s23 + $0xd0] sm:$0xff] }
  0x14   : > { %158 = vst [vmem:[%s1016_s24 + $0x20] sm:$0xff] %v157_v4  ;;  %v179_v15 = vld [vmem:[%s1011_s23 + $0xd8] sm:$0xff]  ;;  %v181_v16 = vld [vmem:[%s1011_s23 + $0x100] sm:$0xff]  ;;  %v183_v17 = vld [vmem:[%s1011_s23 + $0x108] sm:$0xff] }
  0x15   : > { %160 = vst [vmem:[%s1016_s24 + $0x28] sm:$0xff] %v159_v5  ;;  %v185_v18 = vld [vmem:[%s1011_s23 + $0x110] sm:$0xff]  ;;  %v187_v19 = vld [vmem:[%s1011_s23 + $0x118] sm:$0xff]  ;;  %v189_v20 = vld [vmem:[%s1011_s23 + $0x140] sm:$0xff] }
  0x16   : > { %162 = vst [vmem:[%s1016_s24 + $0x30] sm:$0xff] %v161_v6  ;;  %v191_v21 = vld [vmem:[%s1011_s23 + $0x148] sm:$0xff]  ;;  %v193_v22 = vld [vmem:[%s1011_s23 + $0x150] sm:$0xff]  ;;  %v195_v23 = vld [vmem:[%s1011_s23 + $0x158] sm:$0xff] }
  0x17   : > { %164 = vst [vmem:[%s1016_s24 + $0x38] sm:$0xff] %v163_v7  ;;  %v197_v24 = vld [vmem:[%s1011_s23 + $0x180] sm:$0xff]  ;;  %v199_v25 = vld [vmem:[%s1011_s23 + $0x188] sm:$0xff]  ;;  %v201_v26 = vld [vmem:[%s1011_s23 + $0x190] sm:$0xff] }
  0x18   : > { %166 = vst [vmem:[%s1016_s24 + $0x40] sm:$0xff] %v165_v8  ;;  %v203_v27 = vld [vmem:[%s1011_s23 + $0x198] sm:$0xff]  ;;  %v205_v28 = vld [vmem:[%s1011_s23 + $0x1c0] sm:$0xff]  ;;  %v207_v29 = vld [vmem:[%s1011_s23 + $0x1c8] sm:$0xff] }
  0x19   : > { %168 = vst [vmem:[%s1016_s24 + $0x48] sm:$0xff] %v167_v9  ;;  %v209_v30 = vld [vmem:[%s1011_s23 + $0x1d0] sm:$0xff]  ;;  %v211_v31 = vld [vmem:[%s1011_s23 + $0x1d8] sm:$0xff]  ;;  %v213_v32 = vld [vmem:[%s1011_s23 + $0x200] sm:$0xff] }
  0x1a   : > { %170 = vst [vmem:[%s1016_s24 + $0x50] sm:$0xff] %v169_v10  ;;  %v215_v33 = vld [vmem:[%s1011_s23 + $0x208] sm:$0xff]  ;;  %v217_v34 = vld [vmem:[%s1011_s23 + $0x210] sm:$0xff]  ;;  %v219_v35 = vld [vmem:[%s1011_s23 + $0x218] sm:$0xff] }
  0x1b   : > { %172 = vst [vmem:[%s1016_s24 + $0x58] sm:$0xff] %v171_v11  ;;  %v221_v36 = vld [vmem:[%s1011_s23 + $0x240] sm:$0xff]  ;;  %v223_v37 = vld [vmem:[%s1011_s23 + $0x248] sm:$0xff]  ;;  %v225_v38 = vld [vmem:[%s1011_s23 + $0x250] sm:$0xff] }
  0x1c   : > { %174 = vst [vmem:[%s1016_s24 + $0x60] sm:$0xff] %v173_v12  ;;  %v227_v39 = vld [vmem:[%s1011_s23 + $0x258] sm:$0xff]  ;;  %v229_v40 = vld [vmem:[%s1011_s23 + $0x280] sm:$0xff]  ;;  %v231_v41 = vld [vmem:[%s1011_s23 + $0x288] sm:$0xff] }
  0x1d   : > { %176 = vst [vmem:[%s1016_s24 + $0x68] sm:$0xff] %v175_v13  ;;  %v233_v42 = vld [vmem:[%s1011_s23 + $0x290] sm:$0xff]  ;;  %v235_v43 = vld [vmem:[%s1011_s23 + $0x298] sm:$0xff]  ;;  %v237_v44 = vld [vmem:[%s1011_s23 + $0x2c0] sm:$0xff] }
  0x1e   : > { %178 = vst [vmem:[%s1016_s24 + $0x70] sm:$0xff] %v177_v14  ;;  %v239_v45 = vld [vmem:[%s1011_s23 + $0x2c8] sm:$0xff]  ;;  %v241_v46 = vld [vmem:[%s1011_s23 + $0x2d0] sm:$0xff]  ;;  %v243_v47 = vld [vmem:[%s1011_s23 + $0x2d8] sm:$0xff] }
  0x1f   : > { %180 = vst [vmem:[%s1016_s24 + $0x78] sm:$0xff] %v179_v15  ;;  %v245_v48 = vld [vmem:[%s1011_s23 + $0x300] sm:$0xff]  ;;  %v247_v49 = vld [vmem:[%s1011_s23 + $0x308] sm:$0xff]  ;;  %v249_v50 = vld [vmem:[%s1011_s23 + $0x310] sm:$0xff] }
  0x20   : > { %182 = vst [vmem:[%s1016_s24 + $0x80] sm:$0xff] %v181_v16  ;;  %v251_v51 = vld [vmem:[%s1011_s23 + $0x318] sm:$0xff]  ;;  %v253_v52 = vld [vmem:[%s1011_s23 + $0x340] sm:$0xff]  ;;  %v255_v53 = vld [vmem:[%s1011_s23 + $0x348] sm:$0xff] }
  0x21   : > { %184 = vst [vmem:[%s1016_s24 + $0x88] sm:$0xff] %v183_v17  ;;  %v257_v54 = vld [vmem:[%s1011_s23 + $0x350] sm:$0xff]  ;;  %v259_v55 = vld [vmem:[%s1011_s23 + $0x358] sm:$0xff]  ;;  %v261_v56 = vld [vmem:[%s1011_s23 + $0x380] sm:$0xff] }
  0x22   : > { %186 = vst [vmem:[%s1016_s24 + $0x90] sm:$0xff] %v185_v18  ;;  %v263_v57 = vld [vmem:[%s1011_s23 + $0x388] sm:$0xff]  ;;  %v265_v58 = vld [vmem:[%s1011_s23 + $0x390] sm:$0xff]  ;;  %v267_v59 = vld [vmem:[%s1011_s23 + $0x398] sm:$0xff] }
  0x23   : > { %188 = vst [vmem:[%s1016_s24 + $0x98] sm:$0xff] %v187_v19  ;;  %v269_v60 = vld [vmem:[%s1011_s23 + $0x3c0] sm:$0xff]  ;;  %v271_v61 = vld [vmem:[%s1011_s23 + $0x3c8] sm:$0xff]  ;;  %v273_v62 = vld [vmem:[%s1011_s23 + $0x3d0] sm:$0xff] }
  0x24   : > { %190 = vst [vmem:[%s1016_s24 + $0xa0] sm:$0xff] %v189_v20  ;;  %v275_v63 = vld [vmem:[%s1011_s23 + $0x3d8] sm:$0xff]  ;;  %v277_v0 = vld [vmem:[%s1011_s23 + $0x400] sm:$0xff]  ;;  %v279_v1 = vld [vmem:[%s1011_s23 + $0x408] sm:$0xff] }
  0x25   : > { %192 = vst [vmem:[%s1016_s24 + $0xa8] sm:$0xff] %v191_v21  ;;  %v281_v2 = vld [vmem:[%s1011_s23 + $0x410] sm:$0xff]  ;;  %v283_v3 = vld [vmem:[%s1011_s23 + $0x418] sm:$0xff]  ;;  %v285_v4 = vld [vmem:[%s1011_s23 + $0x440] sm:$0xff] }
  0x26   : > { %194 = vst [vmem:[%s1016_s24 + $0xb0] sm:$0xff] %v193_v22  ;;  %v287_v5 = vld [vmem:[%s1011_s23 + $0x448] sm:$0xff]  ;;  %v289_v6 = vld [vmem:[%s1011_s23 + $0x450] sm:$0xff]  ;;  %v291_v7 = vld [vmem:[%s1011_s23 + $0x458] sm:$0xff] }
  0x27   : > { %196 = vst [vmem:[%s1016_s24 + $0xb8] sm:$0xff] %v195_v23  ;;  %v293_v8 = vld [vmem:[%s1011_s23 + $0x480] sm:$0xff]  ;;  %v295_v9 = vld [vmem:[%s1011_s23 + $0x488] sm:$0xff]  ;;  %v297_v10 = vld [vmem:[%s1011_s23 + $0x490] sm:$0xff] }
  0x28   : > { %198 = vst [vmem:[%s1016_s24 + $0xc0] sm:$0xff] %v197_v24  ;;  %v299_v11 = vld [vmem:[%s1011_s23 + $0x498] sm:$0xff]  ;;  %v301_v12 = vld [vmem:[%s1011_s23 + $0x4c0] sm:$0xff]  ;;  %v303_v13 = vld [vmem:[%s1011_s23 + $0x4c8] sm:$0xff] }
  0x29   : > { %200 = vst [vmem:[%s1016_s24 + $0xc8] sm:$0xff] %v199_v25  ;;  %v305_v14 = vld [vmem:[%s1011_s23 + $0x4d0] sm:$0xff]  ;;  %v307_v15 = vld [vmem:[%s1011_s23 + $0x4d8] sm:$0xff]  ;;  %v309_v16 = vld [vmem:[%s1011_s23 + $0x500] sm:$0xff] }
  0x2a   : > { %202 = vst [vmem:[%s1016_s24 + $0xd0] sm:$0xff] %v201_v26  ;;  %v311_v17 = vld [vmem:[%s1011_s23 + $0x508] sm:$0xff]  ;;  %v313_v18 = vld [vmem:[%s1011_s23 + $0x510] sm:$0xff]  ;;  %v315_v19 = vld [vmem:[%s1011_s23 + $0x518] sm:$0xff] }
  0x2b   : > { %204 = vst [vmem:[%s1016_s24 + $0xd8] sm:$0xff] %v203_v27  ;;  %v317_v20 = vld [vmem:[%s1011_s23 + $0x540] sm:$0xff]  ;;  %v319_v21 = vld [vmem:[%s1011_s23 + $0x548] sm:$0xff]  ;;  %v321_v22 = vld [vmem:[%s1011_s23 + $0x550] sm:$0xff] }
  0x2c   : > { %206 = vst [vmem:[%s1016_s24 + $0xe0] sm:$0xff] %v205_v28  ;;  %v323_v23 = vld [vmem:[%s1011_s23 + $0x558] sm:$0xff]  ;;  %v325_v24 = vld [vmem:[%s1011_s23 + $0x580] sm:$0xff]  ;;  %v327_v25 = vld [vmem:[%s1011_s23 + $0x588] sm:$0xff] }
  0x2d   : > { %208 = vst [vmem:[%s1016_s24 + $0xe8] sm:$0xff] %v207_v29  ;;  %v329_v26 = vld [vmem:[%s1011_s23 + $0x590] sm:$0xff]  ;;  %v331_v27 = vld [vmem:[%s1011_s23 + $0x598] sm:$0xff]  ;;  %v333_v28 = vld [vmem:[%s1011_s23 + $0x5c0] sm:$0xff] }
  0x2e   : > { %210 = vst [vmem:[%s1016_s24 + $0xf0] sm:$0xff] %v209_v30  ;;  %v335_v29 = vld [vmem:[%s1011_s23 + $0x5c8] sm:$0xff]  ;;  %v337_v30 = vld [vmem:[%s1011_s23 + $0x5d0] sm:$0xff] }
  0x2f   : > { %212 = vst [vmem:[%s1016_s24 + $0xf8] sm:$0xff] %v211_v31  ;;  %v339_v31 = vld [vmem:[%s1011_s23 + $0x5d8] sm:$0xff] }
  0x30   : > { %214 = vst [vmem:[%s1016_s24 + $0x100] sm:$0xff] %v213_v32  ;;  %v341_v32 = vld [vmem:[%s1011_s23 + $0x600] sm:$0xff] }
  0x31   : > { %216 = vst [vmem:[%s1016_s24 + $0x108] sm:$0xff] %v215_v33  ;;  %v343_v33 = vld [vmem:[%s1011_s23 + $0x608] sm:$0xff] }
  0x32   : > { %218 = vst [vmem:[%s1016_s24 + $0x110] sm:$0xff] %v217_v34  ;;  %v345_v34 = vld [vmem:[%s1011_s23 + $0x610] sm:$0xff] }
  0x33   : > { %220 = vst [vmem:[%s1016_s24 + $0x118] sm:$0xff] %v219_v35  ;;  %v347_v35 = vld [vmem:[%s1011_s23 + $0x618] sm:$0xff] }
  0x34   : > { %222 = vst [vmem:[%s1016_s24 + $0x120] sm:$0xff] %v221_v36  ;;  %v349_v36 = vld [vmem:[%s1011_s23 + $0x640] sm:$0xff] }
  0x35   : > { %224 = vst [vmem:[%s1016_s24 + $0x128] sm:$0xff] %v223_v37  ;;  %v351_v37 = vld [vmem:[%s1011_s23 + $0x648] sm:$0xff] }
  0x36   : > { %226 = vst [vmem:[%s1016_s24 + $0x130] sm:$0xff] %v225_v38  ;;  %v353_v38 = vld [vmem:[%s1011_s23 + $0x650] sm:$0xff] }
  0x37   : > { %228 = vst [vmem:[%s1016_s24 + $0x138] sm:$0xff] %v227_v39  ;;  %v355_v39 = vld [vmem:[%s1011_s23 + $0x658] sm:$0xff] }
  0x38   : > { %230 = vst [vmem:[%s1016_s24 + $0x140] sm:$0xff] %v229_v40  ;;  %v357_v40 = vld [vmem:[%s1011_s23 + $0x680] sm:$0xff] }
  0x39   : > { %232 = vst [vmem:[%s1016_s24 + $0x148] sm:$0xff] %v231_v41  ;;  %v359_v41 = vld [vmem:[%s1011_s23 + $0x688] sm:$0xff] }
  0x3a   : > { %234 = vst [vmem:[%s1016_s24 + $0x150] sm:$0xff] %v233_v42  ;;  %v361_v42 = vld [vmem:[%s1011_s23 + $0x690] sm:$0xff] }
  0x3b   : > { %236 = vst [vmem:[%s1016_s24 + $0x158] sm:$0xff] %v235_v43  ;;  %v363_v43 = vld [vmem:[%s1011_s23 + $0x698] sm:$0xff] }
  0x3c   : > { %238 = vst [vmem:[%s1016_s24 + $0x160] sm:$0xff] %v237_v44  ;;  %v365_v44 = vld [vmem:[%s1011_s23 + $0x6c0] sm:$0xff] }
  0x3d   : > { %240 = vst [vmem:[%s1016_s24 + $0x168] sm:$0xff] %v239_v45  ;;  %v367_v45 = vld [vmem:[%s1011_s23 + $0x6c8] sm:$0xff] }
  0x3e   : > { %242 = vst [vmem:[%s1016_s24 + $0x170] sm:$0xff] %v241_v46  ;;  %v369_v46 = vld [vmem:[%s1011_s23 + $0x6d0] sm:$0xff] }
  0x3f   : > { %244 = vst [vmem:[%s1016_s24 + $0x178] sm:$0xff] %v243_v47  ;;  %v371_v47 = vld [vmem:[%s1011_s23 + $0x6d8] sm:$0xff] }
  0x40   : > { %246 = vst [vmem:[%s1016_s24 + $0x180] sm:$0xff] %v245_v48  ;;  %v373_v48 = vld [vmem:[%s1011_s23 + $0x700] sm:$0xff] }
  0x41   : > { %248 = vst [vmem:[%s1016_s24 + $0x188] sm:$0xff] %v247_v49  ;;  %v375_v49 = vld [vmem:[%s1011_s23 + $0x708] sm:$0xff] }
  0x42   : > { %250 = vst [vmem:[%s1016_s24 + $0x190] sm:$0xff] %v249_v50  ;;  %v377_v50 = vld [vmem:[%s1011_s23 + $0x710] sm:$0xff] }
  0x43   : > { %252 = vst [vmem:[%s1016_s24 + $0x198] sm:$0xff] %v251_v51  ;;  %v379_v51 = vld [vmem:[%s1011_s23 + $0x718] sm:$0xff] }
  0x44   : > { %254 = vst [vmem:[%s1016_s24 + $0x1a0] sm:$0xff] %v253_v52  ;;  %v381_v52 = vld [vmem:[%s1011_s23 + $0x740] sm:$0xff] }
  0x45   : > { %256 = vst [vmem:[%s1016_s24 + $0x1a8] sm:$0xff] %v255_v53  ;;  %v383_v53 = vld [vmem:[%s1011_s23 + $0x748] sm:$0xff] }
  0x46   : > { %258 = vst [vmem:[%s1016_s24 + $0x1b0] sm:$0xff] %v257_v54  ;;  %v385_v54 = vld [vmem:[%s1011_s23 + $0x750] sm:$0xff] }
  0x47   : > { %260 = vst [vmem:[%s1016_s24 + $0x1b8] sm:$0xff] %v259_v55  ;;  %v387_v55 = vld [vmem:[%s1011_s23 + $0x758] sm:$0xff] }
  0x48   : > { %262 = vst [vmem:[%s1016_s24 + $0x1c0] sm:$0xff] %v261_v56  ;;  %v389_v56 = vld [vmem:[%s1011_s23 + $0x780] sm:$0xff] }
  0x49   : > { %264 = vst [vmem:[%s1016_s24 + $0x1c8] sm:$0xff] %v263_v57  ;;  %v391_v57 = vld [vmem:[%s1011_s23 + $0x788] sm:$0xff] }
  0x4a   : > { %266 = vst [vmem:[%s1016_s24 + $0x1d0] sm:$0xff] %v265_v58  ;;  %v393_v58 = vld [vmem:[%s1011_s23 + $0x790] sm:$0xff] }
  0x4b   : > { %268 = vst [vmem:[%s1016_s24 + $0x1d8] sm:$0xff] %v267_v59  ;;  %v395_v59 = vld [vmem:[%s1011_s23 + $0x798] sm:$0xff] }
  0x4c   : > { %270 = vst [vmem:[%s1016_s24 + $0x1e0] sm:$0xff] %v269_v60  ;;  %v397_v60 = vld [vmem:[%s1011_s23 + $0x7c0] sm:$0xff] }
  0x4d   : > { %272 = vst [vmem:[%s1016_s24 + $0x1e8] sm:$0xff] %v271_v61  ;;  %v399_v61 = vld [vmem:[%s1011_s23 + $0x7c8] sm:$0xff] }
  0x4e   : > { %274 = vst [vmem:[%s1016_s24 + $0x1f0] sm:$0xff] %v273_v62  ;;  %v401_v62 = vld [vmem:[%s1011_s23 + $0x7d0] sm:$0xff] }
  0x4f   : > { %276 = vst [vmem:[%s1016_s24 + $0x1f8] sm:$0xff] %v275_v63  ;;  %v403_v63 = vld [vmem:[%s1011_s23 + $0x7d8] sm:$0xff] }
  0x50   : > { %278 = vst [vmem:[%s1016_s24 + $0x200] sm:$0xff] %v277_v0 }
  0x51   : > { %280 = vst [vmem:[%s1016_s24 + $0x208] sm:$0xff] %v279_v1 }
  0x52   : > { %282 = vst [vmem:[%s1016_s24 + $0x210] sm:$0xff] %v281_v2 }
  0x53   : > { %284 = vst [vmem:[%s1016_s24 + $0x218] sm:$0xff] %v283_v3 }
  0x54   : > { %286 = vst [vmem:[%s1016_s24 + $0x220] sm:$0xff] %v285_v4 }
  0x55   : > { %288 = vst [vmem:[%s1016_s24 + $0x228] sm:$0xff] %v287_v5 }
  0x56   : > { %290 = vst [vmem:[%s1016_s24 + $0x230] sm:$0xff] %v289_v6 }
  0x57   : > { %292 = vst [vmem:[%s1016_s24 + $0x238] sm:$0xff] %v291_v7 }
  0x58   : > { %294 = vst [vmem:[%s1016_s24 + $0x240] sm:$0xff] %v293_v8 }
  0x59   : > { %296 = vst [vmem:[%s1016_s24 + $0x248] sm:$0xff] %v295_v9 }
  0x5a   : > { %298 = vst [vmem:[%s1016_s24 + $0x250] sm:$0xff] %v297_v10 }
  0x5b   : > { %300 = vst [vmem:[%s1016_s24 + $0x258] sm:$0xff] %v299_v11 }
  0x5c   : > { %302 = vst [vmem:[%s1016_s24 + $0x260] sm:$0xff] %v301_v12 }
  0x5d   : > { %304 = vst [vmem:[%s1016_s24 + $0x268] sm:$0xff] %v303_v13 }
  0x5e   : > { %306 = vst [vmem:[%s1016_s24 + $0x270] sm:$0xff] %v305_v14 }
  0x5f   : > { %308 = vst [vmem:[%s1016_s24 + $0x278] sm:$0xff] %v307_v15 }
  0x60   : > { %310 = vst [vmem:[%s1016_s24 + $0x280] sm:$0xff] %v309_v16 }
  0x61   : > { %312 = vst [vmem:[%s1016_s24 + $0x288] sm:$0xff] %v311_v17 }
  0x62   : > { %314 = vst [vmem:[%s1016_s24 + $0x290] sm:$0xff] %v313_v18 }
  0x63   : > { %316 = vst [vmem:[%s1016_s24 + $0x298] sm:$0xff] %v315_v19 }
  0x64   : > { %318 = vst [vmem:[%s1016_s24 + $0x2a0] sm:$0xff] %v317_v20 }
  0x65   : > { %320 = vst [vmem:[%s1016_s24 + $0x2a8] sm:$0xff] %v319_v21 }
  0x66   : > { %322 = vst [vmem:[%s1016_s24 + $0x2b0] sm:$0xff] %v321_v22 }
  0x67   : > { %324 = vst [vmem:[%s1016_s24 + $0x2b8] sm:$0xff] %v323_v23 }
  0x68   : > { %326 = vst [vmem:[%s1016_s24 + $0x2c0] sm:$0xff] %v325_v24 }
  0x69   : > { %328 = vst [vmem:[%s1016_s24 + $0x2c8] sm:$0xff] %v327_v25 }
  0x6a   : > { %330 = vst [vmem:[%s1016_s24 + $0x2d0] sm:$0xff] %v329_v26 }
  0x6b   : > { %332 = vst [vmem:[%s1016_s24 + $0x2d8] sm:$0xff] %v331_v27 }
  0x6c   : > { %334 = vst [vmem:[%s1016_s24 + $0x2e0] sm:$0xff] %v333_v28 }
  0x6d   : > { %336 = vst [vmem:[%s1016_s24 + $0x2e8] sm:$0xff] %v335_v29 }
  0x6e   : > { %338 = vst [vmem:[%s1016_s24 + $0x2f0] sm:$0xff] %v337_v30 }
  0x6f   : > { %340 = vst [vmem:[%s1016_s24 + $0x2f8] sm:$0xff] %v339_v31 }
  0x70   : > { %342 = vst [vmem:[%s1016_s24 + $0x300] sm:$0xff] %v341_v32 }
  0x71   : > { %344 = vst [vmem:[%s1016_s24 + $0x308] sm:$0xff] %v343_v33 }
  0x72   : > { %346 = vst [vmem:[%s1016_s24 + $0x310] sm:$0xff] %v345_v34 }
  0x73   : > { %348 = vst [vmem:[%s1016_s24 + $0x318] sm:$0xff] %v347_v35 }
  0x74   : > { %350 = vst [vmem:[%s1016_s24 + $0x320] sm:$0xff] %v349_v36 }
  0x75   : > { %352 = vst [vmem:[%s1016_s24 + $0x328] sm:$0xff] %v351_v37 }
  0x76   : > { %354 = vst [vmem:[%s1016_s24 + $0x330] sm:$0xff] %v353_v38 }
  0x77   : > { %356 = vst [vmem:[%s1016_s24 + $0x338] sm:$0xff] %v355_v39 }
  0x78   : > { %358 = vst [vmem:[%s1016_s24 + $0x340] sm:$0xff] %v357_v40 }
  0x79   : > { %360 = vst [vmem:[%s1016_s24 + $0x348] sm:$0xff] %v359_v41 }
  0x7a   : > { %362 = vst [vmem:[%s1016_s24 + $0x350] sm:$0xff] %v361_v42 }
  0x7b   : > { %364 = vst [vmem:[%s1016_s24 + $0x358] sm:$0xff] %v363_v43 }
  0x7c   : > { %366 = vst [vmem:[%s1016_s24 + $0x360] sm:$0xff] %v365_v44 }
  0x7d   : > { %368 = vst [vmem:[%s1016_s24 + $0x368] sm:$0xff] %v367_v45 }
  0x7e   : > { %370 = vst [vmem:[%s1016_s24 + $0x370] sm:$0xff] %v369_v46 }
  0x7f   : > { %372 = vst [vmem:[%s1016_s24 + $0x378] sm:$0xff] %v371_v47 }
  0x80   : > { %374 = vst [vmem:[%s1016_s24 + $0x380] sm:$0xff] %v373_v48 }
  0x81   : > { %376 = vst [vmem:[%s1016_s24 + $0x388] sm:$0xff] %v375_v49 }
  0x82   : > { %378 = vst [vmem:[%s1016_s24 + $0x390] sm:$0xff] %v377_v50 }
  0x83   : > { %380 = vst [vmem:[%s1016_s24 + $0x398] sm:$0xff] %v379_v51 }
  0x84   : > { %382 = vst [vmem:[%s1016_s24 + $0x3a0] sm:$0xff] %v381_v52 }
  0x85   : > { %384 = vst [vmem:[%s1016_s24 + $0x3a8] sm:$0xff] %v383_v53 }
  0x86   : > { %386 = vst [vmem:[%s1016_s24 + $0x3b0] sm:$0xff] %v385_v54 }
  0x87   : > { %388 = vst [vmem:[%s1016_s24 + $0x3b8] sm:$0xff] %v387_v55 }
  0x88   : > { %390 = vst [vmem:[%s1016_s24 + $0x3c0] sm:$0xff] %v389_v56 }
  0x89   : > { %392 = vst [vmem:[%s1016_s24 + $0x3c8] sm:$0xff] %v391_v57 }
  0x8a   : > { %394 = vst [vmem:[%s1016_s24 + $0x3d0] sm:$0xff] %v393_v58 }
  0x8b   : > { %396 = vst [vmem:[%s1016_s24 + $0x3d8] sm:$0xff] %v395_v59 }
  0x8c   : > { %398 = vst [vmem:[%s1016_s24 + $0x3e0] sm:$0xff] %v397_v60 }
  0x8d   : > { %400 = vst [vmem:[%s1016_s24 + $0x3e8] sm:$0xff] %v399_v61 }
  0x8e   : > { %402 = vst [vmem:[%s1016_s24 + $0x3f0] sm:$0xff] %v401_v62 }
  0x8f   : > { %404 = vst [vmem:[%s1016_s24 + $0x3f8] sm:$0xff] %v403_v63 }
  0x90 PF: > { %p866_p6 = scmp.ge.s32.totalorder %s951_s13, 1  ;;  %p409_p7 = scmp.lt.s32.totalorder %s951_s13, 3 }
  0x92   : > { %p410_p8 = pnand %p866_p6, %p409_p7 }
  0x93   : > { %s416_s25 = sand.u32 (!%p410_p8), 1, %s935_s9   ;;  %s868_s4 = sshll.u32 (!%p410_p8), %s943_s11, 2 }
  0x94   : > { %413 = sbr.rel (%p410_p8) target bundleno = 353 (0x161), region = 47  ;;  %s867_s26 = sshll.u32 (!%p410_p8), %s416_s25, 10 }
  0x95   : > { %s1274_s27 = scalar_lea.vmem (!%p410_p8), [#allocation2], %s867_s26  ;;  %p455_p9 = scmp.lt.s32.totalorder (!%p410_p8), %s868_s4, 7 }
  0x99   : > { %v525_v0 = vld [vmem:[%s1274_s27 + $0x1e8] sm:$0xff]  ;;  %v524_v6 = vld [vmem:[%s1274_s27 + $0x1e0] sm:$0xff]  ;;  %v527_v60 = vld [vmem:[%s1274_s27 + $0x1f8] sm:$0xff]  ;;  %s1439_s4 = smov (!%p455_p9, %s868_s4), 7 }
  0x9a   : > { %v589_v1 = vld [vmem:[%s1274_s27 + $0x3e8] sm:$0xff]  ;;  %632 = vmatpush.msra.mxu2 %v525_v0  ;;  %v588_v7 = vld [vmem:[%s1274_s27 + $0x3e0] sm:$0xff]  ;;  %592 = vmatpush.msra.mxu0 %v524_v6  ;;  %v591_v61 = vld [vmem:[%s1274_s27 + $0x3f8] sm:$0xff]  ;;  %s869_s5 = sshll.u32 %s1439_s4, 3 }
  0x9b   : > { %v521_v2 = vld [vmem:[%s1274_s27 + $0x1c8] sm:$0xff]  ;;  %652 = vmatpush.msra.mxu3 %v589_v1  ;;  %v520_v8 = vld [vmem:[%s1274_s27 + $0x1c0] sm:$0xff]  ;;  %612 = vmatpush.msra.mxu1 %v588_v7  ;;  %v523_v0 = vld [vmem:[%s1274_s27 + $0x1d8] sm:$0xff]  ;;  %s460_s8 = scalar_lea.vmem %s1431_s2, %s869_s5 }
  0x9c   : > { %v585_v3 = vld [vmem:[%s1274_s27 + $0x3c8] sm:$0xff]  ;;  %633 = vmatpush.msra.mxu2 %v521_v2  ;;  %v584_v9 = vld [vmem:[%s1274_s27 + $0x3c0] sm:$0xff]  ;;  %593 = vmatpush.msra.mxu0 %v520_v8  ;;  %v587_v1 = vld [vmem:[%s1274_s27 + $0x3d8] sm:$0xff] }
  0x9d   : > { %v517_v4 = vld [vmem:[%s1274_s27 + $0x1a8] sm:$0xff]  ;;  %653 = vmatpush.msra.mxu3 %v585_v3  ;;  %v516_v12 = vld [vmem:[%s1274_s27 + $0x1a0] sm:$0xff]  ;;  %613 = vmatpush.msra.mxu1 %v584_v9  ;;  %v526_v6 = vld [vmem:[%s1274_s27 + $0x1f0] sm:$0xff] }
  0x9e   : > { %v581_v5 = vld [vmem:[%s1274_s27 + $0x3a8] sm:$0xff]  ;;  %634 = vmatpush.msra.mxu2 %v517_v4  ;;  %v580_v13 = vld [vmem:[%s1274_s27 + $0x3a0] sm:$0xff]  ;;  %594 = vmatpush.msra.mxu0 %v516_v12  ;;  %v519_v4 = vld [vmem:[%s1274_s27 + $0x1b8] sm:$0xff] }
  0x9f   : > { %v513_v10 = vld [vmem:[%s1274_s27 + $0x188] sm:$0xff]  ;;  %654 = vmatpush.msra.mxu3 %v581_v5  ;;  %v512_v16 = vld [vmem:[%s1274_s27 + $0x180] sm:$0xff]  ;;  %614 = vmatpush.msra.mxu1 %v580_v13  ;;  %v583_v5 = vld [vmem:[%s1274_s27 + $0x3b8] sm:$0xff] }
  0xa0   : > { %v577_v11 = vld [vmem:[%s1274_s27 + $0x388] sm:$0xff]  ;;  %635 = vmatpush.msra.mxu2 %v513_v10  ;;  %v576_v17 = vld [vmem:[%s1274_s27 + $0x380] sm:$0xff]  ;;  %595 = vmatpush.msra.mxu0 %v512_v16  ;;  %v590_v7 = vld [vmem:[%s1274_s27 + $0x3f0] sm:$0xff] }
  0xa1   : > { %v509_v14 = vld [vmem:[%s1274_s27 + $0x168] sm:$0xff]  ;;  %655 = vmatpush.msra.mxu3 %v577_v11  ;;  %v508_v20 = vld [vmem:[%s1274_s27 + $0x160] sm:$0xff]  ;;  %615 = vmatpush.msra.mxu1 %v576_v17  ;;  %v515_v8 = vld [vmem:[%s1274_s27 + $0x198] sm:$0xff] }
  0xa2   : > { %v573_v15 = vld [vmem:[%s1274_s27 + $0x368] sm:$0xff]  ;;  %636 = vmatpush.msra.mxu2 %v509_v14  ;;  %v572_v21 = vld [vmem:[%s1274_s27 + $0x360] sm:$0xff]  ;;  %596 = vmatpush.msra.mxu0 %v508_v20  ;;  %v579_v9 = vld [vmem:[%s1274_s27 + $0x398] sm:$0xff] }
  0xa3   : > { %v505_v18 = vld [vmem:[%s1274_s27 + $0x148] sm:$0xff]  ;;  %656 = vmatpush.msra.mxu3 %v573_v15  ;;  %v504_v24 = vld [vmem:[%s1274_s27 + $0x140] sm:$0xff]  ;;  %616 = vmatpush.msra.mxu1 %v572_v21  ;;  %v522_v10 = vld [vmem:[%s1274_s27 + $0x1d0] sm:$0xff] }
  0xa4   : > { %v569_v19 = vld [vmem:[%s1274_s27 + $0x348] sm:$0xff]  ;;  %637 = vmatpush.msra.mxu2 %v505_v18  ;;  %v568_v25 = vld [vmem:[%s1274_s27 + $0x340] sm:$0xff]  ;;  %597 = vmatpush.msra.mxu0 %v504_v24  ;;  %v586_v11 = vld [vmem:[%s1274_s27 + $0x3d0] sm:$0xff] }
  0xa5   : > { %v501_v22 = vld [vmem:[%s1274_s27 + $0x128] sm:$0xff]  ;;  %657 = vmatpush.msra.mxu3 %v569_v19  ;;  %v500_v28 = vld [vmem:[%s1274_s27 + $0x120] sm:$0xff]  ;;  %617 = vmatpush.msra.mxu1 %v568_v25  ;;  %v511_v12 = vld [vmem:[%s1274_s27 + $0x178] sm:$0xff] }
  0xa6   : > { %v565_v23 = vld [vmem:[%s1274_s27 + $0x328] sm:$0xff]  ;;  %638 = vmatpush.msra.mxu2 %v501_v22  ;;  %v564_v29 = vld [vmem:[%s1274_s27 + $0x320] sm:$0xff]  ;;  %598 = vmatpush.msra.mxu0 %v500_v28  ;;  %v575_v13 = vld [vmem:[%s1274_s27 + $0x378] sm:$0xff] }
  0xa7   : > { %v497_v26 = vld [vmem:[%s1274_s27 + $0x108] sm:$0xff]  ;;  %658 = vmatpush.msra.mxu3 %v565_v23  ;;  %v496_v32 = vld [vmem:[%s1274_s27 + $0x100] sm:$0xff]  ;;  %618 = vmatpush.msra.mxu1 %v564_v29  ;;  %v518_v14 = vld [vmem:[%s1274_s27 + $0x1b0] sm:$0xff] }
  0xa8   : > { %v561_v27 = vld [vmem:[%s1274_s27 + $0x308] sm:$0xff]  ;;  %639 = vmatpush.msra.mxu2 %v497_v26  ;;  %v560_v33 = vld [vmem:[%s1274_s27 + $0x300] sm:$0xff]  ;;  %599 = vmatpush.msra.mxu0 %v496_v32  ;;  %v582_v15 = vld [vmem:[%s1274_s27 + $0x3b0] sm:$0xff] }
  0xa9   : > { %v493_v30 = vld [vmem:[%s1274_s27 + $0xe8] sm:$0xff]  ;;  %659 = vmatpush.msra.mxu3 %v561_v27  ;;  %v492_v36 = vld [vmem:[%s1274_s27 + $0xe0] sm:$0xff]  ;;  %619 = vmatpush.msra.mxu1 %v560_v33  ;;  %v507_v16 = vld [vmem:[%s1274_s27 + $0x158] sm:$0xff] }
  0xaa   : > { %v557_v31 = vld [vmem:[%s1274_s27 + $0x2e8] sm:$0xff]  ;;  %640 = vmatpush.msra.mxu2 %v493_v30  ;;  %v556_v37 = vld [vmem:[%s1274_s27 + $0x2e0] sm:$0xff]  ;;  %600 = vmatpush.msra.mxu0 %v492_v36  ;;  %v571_v17 = vld [vmem:[%s1274_s27 + $0x358] sm:$0xff] }
  0xab   : > { %v489_v34 = vld [vmem:[%s1274_s27 + $0xc8] sm:$0xff]  ;;  %660 = vmatpush.msra.mxu3 %v557_v31  ;;  %v488_v40 = vld [vmem:[%s1274_s27 + $0xc0] sm:$0xff]  ;;  %620 = vmatpush.msra.mxu1 %v556_v37  ;;  %v514_v18 = vld [vmem:[%s1274_s27 + $0x190] sm:$0xff] }
  0xac   : > { %v553_v35 = vld [vmem:[%s1274_s27 + $0x2c8] sm:$0xff]  ;;  %641 = vmatpush.msra.mxu2 %v489_v34  ;;  %v552_v41 = vld [vmem:[%s1274_s27 + $0x2c0] sm:$0xff]  ;;  %601 = vmatpush.msra.mxu0 %v488_v40  ;;  %v578_v19 = vld [vmem:[%s1274_s27 + $0x390] sm:$0xff] }
  0xad   : > { %v485_v38 = vld [vmem:[%s1274_s27 + $0xa8] sm:$0xff]  ;;  %661 = vmatpush.msra.mxu3 %v553_v35  ;;  %v484_v44 = vld [vmem:[%s1274_s27 + $0xa0] sm:$0xff]  ;;  %621 = vmatpush.msra.mxu1 %v552_v41  ;;  %v503_v20 = vld [vmem:[%s1274_s27 + $0x138] sm:$0xff] }
  0xae   : > { %v549_v39 = vld [vmem:[%s1274_s27 + $0x2a8] sm:$0xff]  ;;  %642 = vmatpush.msra.mxu2 %v485_v38  ;;  %v548_v45 = vld [vmem:[%s1274_s27 + $0x2a0] sm:$0xff]  ;;  %602 = vmatpush.msra.mxu0 %v484_v44  ;;  %v567_v21 = vld [vmem:[%s1274_s27 + $0x338] sm:$0xff] }
  0xaf   : > { %v481_v42 = vld [vmem:[%s1274_s27 + $0x88] sm:$0xff]  ;;  %662 = vmatpush.msra.mxu3 %v549_v39  ;;  %v480_v48 = vld [vmem:[%s1274_s27 + $0x80] sm:$0xff]  ;;  %622 = vmatpush.msra.mxu1 %v548_v45  ;;  %v510_v22 = vld [vmem:[%s1274_s27 + $0x170] sm:$0xff] }
  0xb0   : > { %v545_v43 = vld [vmem:[%s1274_s27 + $0x288] sm:$0xff]  ;;  %643 = vmatpush.msra.mxu2 %v481_v42  ;;  %v544_v49 = vld [vmem:[%s1274_s27 + $0x280] sm:$0xff]  ;;  %603 = vmatpush.msra.mxu0 %v480_v48  ;;  %v574_v23 = vld [vmem:[%s1274_s27 + $0x370] sm:$0xff] }
  0xb1   : > { %v477_v46 = vld [vmem:[%s1274_s27 + $0x68] sm:$0xff]  ;;  %663 = vmatpush.msra.mxu3 %v545_v43  ;;  %v476_v52 = vld [vmem:[%s1274_s27 + $0x60] sm:$0xff]  ;;  %623 = vmatpush.msra.mxu1 %v544_v49  ;;  %v499_v24 = vld [vmem:[%s1274_s27 + $0x118] sm:$0xff] }
  0xb2   : > { %v541_v47 = vld [vmem:[%s1274_s27 + $0x268] sm:$0xff]  ;;  %644 = vmatpush.msra.mxu2 %v477_v46  ;;  %v540_v53 = vld [vmem:[%s1274_s27 + $0x260] sm:$0xff]  ;;  %604 = vmatpush.msra.mxu0 %v476_v52  ;;  %v563_v25 = vld [vmem:[%s1274_s27 + $0x318] sm:$0xff] }
  0xb3   : > { %v473_v50 = vld [vmem:[%s1274_s27 + $0x48] sm:$0xff]  ;;  %664 = vmatpush.msra.mxu3 %v541_v47  ;;  %v472_v56 = vld [vmem:[%s1274_s27 + $0x40] sm:$0xff]  ;;  %624 = vmatpush.msra.mxu1 %v540_v53  ;;  %v506_v26 = vld [vmem:[%s1274_s27 + $0x150] sm:$0xff] }
  0xb4   : > { %v537_v51 = vld [vmem:[%s1274_s27 + $0x248] sm:$0xff]  ;;  %645 = vmatpush.msra.mxu2 %v473_v50  ;;  %v536_v57 = vld [vmem:[%s1274_s27 + $0x240] sm:$0xff]  ;;  %605 = vmatpush.msra.mxu0 %v472_v56  ;;  %v570_v27 = vld [vmem:[%s1274_s27 + $0x350] sm:$0xff] }
  0xb5   : > { %v469_v54 = vld [vmem:[%s1274_s27 + $0x28] sm:$0xff]  ;;  %665 = vmatpush.msra.mxu3 %v537_v51  ;;  %625 = vmatpush.msra.mxu1 %v536_v57  ;;  %v468_v62 = vld [vmem:[%s1274_s27 + $0x20] sm:$0xff]  ;;  %v495_v28 = vld [vmem:[%s1274_s27 + $0xf8] sm:$0xff] }
  0xb6   : > { %v533_v55 = vld [vmem:[%s1274_s27 + $0x228] sm:$0xff]  ;;  %646 = vmatpush.msra.mxu2 %v469_v54  ;;  %v532_v63 = vld [vmem:[%s1274_s27 + $0x220] sm:$0xff]  ;;  %606 = vmatpush.msra.mxu0 %v468_v62  ;;  %v559_v29 = vld [vmem:[%s1274_s27 + $0x2f8] sm:$0xff] }
  0xb7   : > { %v465_v58 = vld [vmem:[%s1274_s27 + $0x8] sm:$0xff]  ;;  %666 = vmatpush.msra.mxu3 %v533_v55  ;;  %v464_v2 = vld [vmem:[%s1274_s27] sm:$0xff]  ;;  %626 = vmatpush.msra.mxu1 %v532_v63  ;;  %v502_v30 = vld [vmem:[%s1274_s27 + $0x130] sm:$0xff] }
  0xb8   : > { %v529_v59 = vld [vmem:[%s1274_s27 + $0x208] sm:$0xff]  ;;  %647 = vmatpush.msra.mxu2 %v465_v58  ;;  %v528_v3 = vld [vmem:[%s1274_s27 + $0x200] sm:$0xff]  ;;  %607 = vmatpush.msra.mxu0 %v464_v2  ;;  %v566_v31 = vld [vmem:[%s1274_s27 + $0x330] sm:$0xff] }
  0xb9   : > { %667 = vmatpush.msra.mxu3 %v529_v59  ;;  %627 = vmatpush.msra.mxu1 %v528_v3  ;;  %v491_v32 = vld [vmem:[%s1274_s27 + $0xd8] sm:$0xff]  ;;  %v498_v34 = vld [vmem:[%s1274_s27 + $0x110] sm:$0xff]  ;;  %v462_v42 = vld [vmem:[%s1429_s0] sm:$0xff] }
  0xba   : > { %712 = vmatpush.msrb.mxu2 %v527_v60  ;;  %672 = vmatpush.msrb.mxu0 %v526_v6  ;;  %v555_v33 = vld [vmem:[%s1274_s27 + $0x2d8] sm:$0xff]  ;;  %v562_v35 = vld [vmem:[%s1274_s27 + $0x310] sm:$0xff]  ;;  %v463_v43 = vld [vmem:[%s1429_s0 + $0x8] sm:$0xff] }
  0xbb   : > { %732 = vmatpush.msrb.mxu3 %v591_v61  ;;  %692 = vmatpush.msrb.mxu1 %v590_v7  ;;  %v487_v36 = vld [vmem:[%s1274_s27 + $0xb8] sm:$0xff]  ;;  %v494_v38 = vld [vmem:[%s1274_s27 + $0xf0] sm:$0xff] }
  0xbc   : > { %713 = vmatpush.msrb.mxu2 %v523_v0  ;;  %673 = vmatpush.msrb.mxu0 %v522_v10  ;;  %v551_v37 = vld [vmem:[%s1274_s27 + $0x2b8] sm:$0xff]  ;;  %v558_v39 = vld [vmem:[%s1274_s27 + $0x2f0] sm:$0xff] }
  0xbd   : > { %733 = vmatpush.msrb.mxu3 %v587_v1  ;;  %693 = vmatpush.msrb.mxu1 %v586_v11  ;;  %v483_v40 = vld [vmem:[%s1274_s27 + $0x98] sm:$0xff]  ;;  %v490_v44 = vld [vmem:[%s1274_s27 + $0xd0] sm:$0xff] }
  0xbe   : > { %714 = vmatpush.msrb.mxu2 %v519_v4  ;;  %674 = vmatpush.msrb.mxu0 %v518_v14  ;;  %v547_v41 = vld [vmem:[%s1274_s27 + $0x298] sm:$0xff]  ;;  %v554_v45 = vld [vmem:[%s1274_s27 + $0x2d0] sm:$0xff] }
  0xbf   : > { %734 = vmatpush.msrb.mxu3 %v583_v5  ;;  %694 = vmatpush.msrb.mxu1 %v582_v15  ;;  %v479_v46 = vld [vmem:[%s1274_s27 + $0x78] sm:$0xff]  ;;  %v486_v48 = vld [vmem:[%s1274_s27 + $0xb0] sm:$0xff] }
  0xc0   : > { %715 = vmatpush.msrb.mxu2 %v515_v8  ;;  %675 = vmatpush.msrb.mxu0 %v514_v18  ;;  %v543_v47 = vld [vmem:[%s1274_s27 + $0x278] sm:$0xff]  ;;  %v550_v49 = vld [vmem:[%s1274_s27 + $0x2b0] sm:$0xff] }
  0xc1   : > { %735 = vmatpush.msrb.mxu3 %v579_v9  ;;  %695 = vmatpush.msrb.mxu1 %v578_v19  ;;  %v475_v50 = vld [vmem:[%s1274_s27 + $0x58] sm:$0xff]  ;;  %v482_v52 = vld [vmem:[%s1274_s27 + $0x90] sm:$0xff] }
  0xc2   : > { %716 = vmatpush.msrb.mxu2 %v511_v12  ;;  %676 = vmatpush.msrb.mxu0 %v510_v22  ;;  %v539_v51 = vld [vmem:[%s1274_s27 + $0x258] sm:$0xff]  ;;  %v546_v53 = vld [vmem:[%s1274_s27 + $0x290] sm:$0xff] }
  0xc3   : > { %736 = vmatpush.msrb.mxu3 %v575_v13  ;;  %696 = vmatpush.msrb.mxu1 %v574_v23  ;;  %v471_v54 = vld [vmem:[%s1274_s27 + $0x38] sm:$0xff]  ;;  %v478_v56 = vld [vmem:[%s1274_s27 + $0x70] sm:$0xff] }
  0xc4   : > { %717 = vmatpush.msrb.mxu2 %v507_v16  ;;  %677 = vmatpush.msrb.mxu0 %v506_v26  ;;  %v535_v55 = vld [vmem:[%s1274_s27 + $0x238] sm:$0xff]  ;;  %v542_v57 = vld [vmem:[%s1274_s27 + $0x270] sm:$0xff] }
  0xc5   : > { %737 = vmatpush.msrb.mxu3 %v571_v17  ;;  %697 = vmatpush.msrb.mxu1 %v570_v27  ;;  %v467_v58 = vld [vmem:[%s1274_s27 + $0x18] sm:$0xff]  ;;  %v474_v60 = vld [vmem:[%s1274_s27 + $0x50] sm:$0xff] }
  0xc6   : > { %718 = vmatpush.msrb.mxu2 %v503_v20  ;;  %678 = vmatpush.msrb.mxu0 %v502_v30  ;;  %v531_v59 = vld [vmem:[%s1274_s27 + $0x218] sm:$0xff]  ;;  %v538_v61 = vld [vmem:[%s1274_s27 + $0x250] sm:$0xff] }
  0xc7   : > { %738 = vmatpush.msrb.mxu3 %v567_v21  ;;  %698 = vmatpush.msrb.mxu1 %v566_v31  ;;  %v470_v62 = vld [vmem:[%s1274_s27 + $0x30] sm:$0xff] }
  0xc8   : > { %719 = vmatpush.msrb.mxu2 %v499_v24  ;;  %679 = vmatpush.msrb.mxu0 %v498_v34  ;;  %v534_v63 = vld [vmem:[%s1274_s27 + $0x230] sm:$0xff] }
  0xc9   : > { %739 = vmatpush.msrb.mxu3 %v563_v25  ;;  %699 = vmatpush.msrb.mxu1 %v562_v35  ;;  %v466_v0 = vld [vmem:[%s1274_s27 + $0x10] sm:$0xff] }
  0xca   : > { %720 = vmatpush.msrb.mxu2 %v495_v28  ;;  %680 = vmatpush.msrb.mxu0 %v494_v38  ;;  %v530_v1 = vld [vmem:[%s1274_s27 + $0x210] sm:$0xff] }
  0xcb   : > { %740 = vmatpush.msrb.mxu3 %v559_v29  ;;  %700 = vmatpush.msrb.mxu1 %v558_v39 }
  0xcc   : > { %721 = vmatpush.msrb.mxu2 %v491_v32  ;;  %668 = vmatmul.f32.vlgmr.msra.gmra.mxu3 %v463_v43 }
  0xcd   : > { %741 = vmatpush.msrb.mxu3 %v555_v33  ;;  %648 = vmatmul.f32.vlgmr.msra.gmra.mxu2 %v462_v42 }
  0xce   : > { %722 = vmatpush.msrb.mxu2 %v487_v36  ;;  %681 = vmatpush.msrb.mxu0 %v490_v44 }
  0xcf   : > { %742 = vmatpush.msrb.mxu3 %v551_v37  ;;  %701 = vmatpush.msrb.mxu1 %v554_v45 }
  0xd0   : > { %723 = vmatpush.msrb.mxu2 %v483_v40  ;;  %682 = vmatpush.msrb.mxu0 %v486_v48 }
  0xd1   : > { %743 = vmatpush.msrb.mxu3 %v547_v41  ;;  %702 = vmatpush.msrb.mxu1 %v550_v49 }
  0xd2   : > { %724 = vmatpush.msrb.mxu2 %v479_v46  ;;  %683 = vmatpush.msrb.mxu0 %v482_v52 }
  0xd3   : > { %744 = vmatpush.msrb.mxu3 %v543_v47  ;;  %703 = vmatpush.msrb.mxu1 %v546_v53 }
  0xd4   : > { %725 = vmatpush.msrb.mxu2 %v475_v50  ;;  %608 = vmatmul.f32.vlgmr.msra.gmra.mxu0 %v462_v42 }
  0xd5   : > { %745 = vmatpush.msrb.mxu3 %v539_v51  ;;  %628 = vmatmul.f32.vlgmr.msra.gmra.mxu1 %v463_v43 }
  0xd6   : > { %726 = vmatpush.msrb.mxu2 %v471_v54  ;;  %684 = vmatpush.msrb.mxu0 %v478_v56 }
  0xd7   : > { %746 = vmatpush.msrb.mxu3 %v535_v55  ;;  %704 = vmatpush.msrb.mxu1 %v542_v57 }
  0xd8   : > { %727 = vmatpush.msrb.mxu2 %v467_v58  ;;  %685 = vmatpush.msrb.mxu0 %v474_v60 }
  0xd9   : > { %747 = vmatpush.msrb.mxu3 %v531_v59  ;;  %705 = vmatpush.msrb.mxu1 %v538_v61 }
  0xda   : > { %728 = vmatmul.f32.vlgmr.msrb.gmra.mxu2 %v462_v42  ;;  %748 = vmatmul.f32.vlgmr.msrb.gmra.mxu3 %v463_v43 }
  0xdb   : > { %686 = vmatpush.msrb.mxu0 %v470_v62  ;;  %706 = vmatpush.msrb.mxu1 %v534_v63 }
  0xdd   : > { %687 = vmatpush.msrb.mxu0 %v466_v0  ;;  %707 = vmatpush.msrb.mxu1 %v530_v1 }
  0xde   : > { %688 = vmatmul.f32.vlgmr.msrb.gmra.mxu0 %v462_v42  ;;  %708 = vmatmul.f32.vlgmr.msrb.gmra.mxu1 %v463_v43 }
 0x14f   : > { %v669_v6 = vpop.f32.mrf.mxu3 }
 0x150   : > { %v649_v5 = vpop.f32.mrf.mxu2 }
 0x151   : > { %v609_v2 = vpop.f32.mrf.mxu0  ;;  %v670_v7 = vadd.f32 %v669_v6, %v649_v5 }
 0x152   : > { %v629_v3 = vpop.f32.mrf.mxu1 }
 0x153   : > { %v630_v4 = vadd.f32 %v629_v3, %v609_v2  ;;  %753 = vst [vmem:[%s460_s8 + $0x8] sm:$0xff] %v670_v7 }
 0x155   : > { %752 = vst [vmem:[%s460_s8] sm:$0xff] %v630_v4 }
 0x15b   : > { %v689_v8 = vpop.f32.mrf.mxu0  ;;  %v709_v9 = vpop.f32.mrf.mxu1 }
 0x15c   : > { %v710_v10 = vadd.f32 %v709_v9, %v689_v8 }
 0x15d   : > { %v729_v11 = vpop.f32.mrf.mxu2  ;;  %v749_v12 = vpop.f32.mrf.mxu3 }
 0x15e   : > { %754 = vst [vmem:[%s460_s8 + $0x10] sm:$0xff] %v710_v10  ;;  %v750_v13 = vadd.f32 %v749_v12, %v729_v11 }
 0x160   : > { %755 = vst [vmem:[%s460_s8 + $0x18] sm:$0xff] %v750_v13 }
 0x161 PF: > { %s12_s13 = sadd.s32 1, %s951_s13   ;;  %s1432_s9 = smov %s939_s10 }
 0x162   : > { %p9_p10 = scmp.ge.s32.totalorder %s12_s13, 4   ;;  %s1433_s10 = smov %s1003_s17 }
 0x163   : > { %s1434_s11 = smov %s947_s12  ;;  %s1435_s12 = smov %s1437_s14 }
 0x164   :  { %11 = sbr.rel (!%p9_p10) target bundleno = 3 (0x3), region = 89 }

</bundles_post_ra>
